<compile_context>
chip_gen: v5e
topology: v5e:2x2
jax: 0.10.0
libtpu: 0.0.40
codegen_flags: <defaults>
</compile_context>

<pallas_src>
import functools
import math

import jax
import jax.numpy as jnp
import numpy as np
from jax.experimental import pallas as pl
from jax.experimental.pallas import tpu as pltpu

# ---------------- config (mirrors the PyTorch config this module expects) ----
VOCAB_SIZE   = 64
D_EMBED      = 32
N_HEAD       = 2
N_LAYER      = 2
CONTEXT_SIZE = 16
D_FF         = 64
USE_FF       = True
W_QK_MODE    = "diag"    # per-head diagonal W_q / W_k   (config.W_qk_mode)
W_V_MODE     = "diag"    # per-head diagonal W_v         (config.W_v_mode)
W_O_MODE     = "proj"    # concat-heads output projection(config.W_o_mode)
USE_W_LR     = True
USE_W_N      = True
BIAS         = False     # MLP linears without bias
DROPOUT      = 0.0       # dropout is identity

V_PAD  = 128             # vocab padded to one lane tile (lane-dense logits)
FF_PAD = 128             # d_ff padded to one lane tile  (padded cols are 0)
H_PAD  = 8               # per-head diag tables padded to one sublane tile

# -------- PACK_A layout: (A_ROWS, D_EMBED) f32, sublane-stacked operands -----
A_WTE  = 0                                   # (V_PAD, D)   zero-padded wte
A_QP   = A_WTE + V_PAD                       # (C, D)       wpe[1:C+1]  (Q src)
A_KP   = A_QP + CONTEXT_SIZE                 # (C, D)       wpe[0:C]    (K src)
A_WQ   = A_KP + CONTEXT_SIZE                 # (H_PAD, D)   diag W_q  (pad rows 0)
A_WK   = A_WQ + H_PAD                        # (H_PAD, D)   diag W_k
A_WVE  = A_WK + H_PAD                        # (H_PAD, D)   diag W_v * W_LR folded
A_WOT  = A_WVE + H_PAD                       # (H*D, D)     W_o^T
A_FC2T = A_WOT + N_HEAD * D_EMBED            # (FF_PAD, D)  fc2^T (pad rows 0)
A_ROWS = A_FC2T + FF_PAD                     # = 376 (multiple of 8)

# -------- PACK_B layout: (B_ROWS, V_PAD) f32 ---------------------------------
B_WTET = 0                                   # (D, V_PAD)   wte^T (pad cols 0)
B_FC1T = B_WTET + D_EMBED                    # (D, V_PAD)   fc1^T (pad cols 0)
B_ROWS = B_FC1T + D_EMBED                    # = 64

_INV_SQRT2 = 0.7071067811865476
_NEG_INF = -1e30   # f32 activations; revisit if ever moved to bf16


# ------------------------------ in-kernel math --------------------------------
def _erf_f32(z):
    # TODO(synk): nn.GELU() uses exact erf; lax.erf has no guaranteed Mosaic
    # lowering, so erf is evaluated with the Abramowitz & Stegun 7.1.26
    # polynomial (|abs err| < 1.5e-7 ~ f32 eps) using only exp/mul/add/div.
    a1, a2, a3, a4, a5 = (0.254829592, -0.284496736, 1.421413741,
                          -1.453152027, 1.061405429)
    p = 0.3275911
    sgn = jnp.where(z >= 0.0, 1.0, -1.0)
    az = jnp.abs(z)
    t = 1.0 / (1.0 + p * az)            # exact divide (keeps erf accuracy)
    poly = ((((a5 * t + a4) * t + a3) * t + a2) * t + a1) * t
    return sgn * (1.0 - poly * jnp.exp(-az * az))


def _gelu_exact(x):
    return 0.5 * x * (1.0 + _erf_f32(x * _INV_SQRT2))


# ------------------------------ fused kernel ----------------------------------
def _gdgpt_fused_kernel(idx_ref, packa_ref, packb_ref, logits_ref, *,
                        batch, seq, n_vocab):
    """Single-program fused forward.

    idx_ref    : (B*S, 1) int32   token ids (flattened b-major)
    packa_ref  : (A_ROWS, D)      packed narrow operands (see layout above)
    packb_ref  : (B_ROWS, V_PAD)  packed wide operands
    logits_ref : (B, V_PAD)       lane-dense logits output (cols >= V are 0)
    """
    B, S = batch, seq
    D, H = D_EMBED, N_HEAD

    # ---- unpack (static, 8-row-aligned slices of two operands) --------------
    wte_pad  = packa_ref[A_WTE:A_WTE + V_PAD, :]          # (128, D)
    qp       = packa_ref[A_QP:A_QP + S, :]                # (S, D)  wpe[1:S+1]
    kp       = packa_ref[A_KP:A_KP + S, :]                # (S, D)  wpe[0:S]
    wq       = packa_ref[A_WQ:A_WQ + H_PAD, :]            # (8, D)
    wk       = packa_ref[A_WK:A_WK + H_PAD, :]            # (8, D)
    wve      = packa_ref[A_WVE:A_WVE + H_PAD, :]          # (8, D)  W_v*W_LR
    woT      = packa_ref[A_WOT:A_WOT + H * D, :]          # (H*D, D)
    fc2T     = packa_ref[A_FC2T:A_FC2T + FF_PAD, :]       # (128, D) pad rows 0
    wteT_pad = packb_ref[B_WTET:B_WTET + D, :]            # (D, 128)
    fc1T_pad = packb_ref[B_FC1T:B_FC1T + D, :]            # (D, 128) pad cols 0

    # ---- embedding gather in-kernel (one-hot matmul), V = e - E_wte ---------
    # E_wte = mean over TRUE vocab rows (zero padding does not perturb the sum)
    e_wte = jnp.sum(wte_pad, axis=0, keepdims=True) * (1.0 / float(n_vocab))
    idx_col = idx_ref[...]                                              # (B*S, 1)
    vocab_iota = jax.lax.broadcasted_iota(jnp.int32, (B * S, V_PAD), 1)
    onehot = (idx_col == vocab_iota).astype(jnp.float32)                # (B*S, 128)
    e_flat = jnp.dot(onehot, wte_pad, preferred_element_type=jnp.float32)
    v_flat = e_flat - e_wte                                             # (B*S, D)

    # ---- only output row t = S-1 reaches lm_head.  torch's y.view(B,S,H*D) on
    # the contiguous (B,H,S,D) tensor maps out[b, S-1, c*D:(c+1)*D] to
    # y[b, h_c, s_c, :] with h_c*S + s_c == (S-1)*H + c  (static constants). ---
    pairs = [(((S - 1) * H + c) // S, ((S - 1) * H + c) % S) for c in range(H)]
    heads_needed = sorted({h for h, _ in pairs})

    # ---- batch-invariant attention probabilities (needed heads only) --------
    row_i = jax.lax.broadcasted_iota(jnp.int32, (S, S), 0)
    col_i = jax.lax.broadcasted_iota(jnp.int32, (S, S), 1)
    causal = col_i <= row_i
    probs = {}
    for h in heads_needed:
        q_h = qp * wq[h:h + 1, :]                 # Q @ diag(W_q[h])
        k_h = kp * wk[h:h + 1, :]                 # K @ diag(W_k[h])
        s_h = jax.lax.dot_general(q_h, k_h, (((1,), (1,)), ((), ())),
                                  preferred_element_type=jnp.float32)  # (S, S)
        s_h = jnp.where(causal, s_h, _NEG_INF)
        m_h = jnp.max(s_h, axis=-1, keepdims=True)
        p_h = jnp.exp(s_h - m_h)
        denom = jnp.sum(p_h, axis=-1, keepdims=True)
        probs[h] = p_h * pl.reciprocal(denom, approx=True)   # EUP slot, ~free

    # Needed probability rows with the W_N row scale 1/(s+1) folded in, and the
    # matching per-row (W_v * W_LR) diag values.
    p_rows, wv_rows = [], []
    for (h_c, s_c) in pairs:
        p_rows.append(probs[h_c][s_c:s_c + 1, :] * (1.0 / float(s_c + 1)))
        wv_rows.append(wve[h_c:h_c + 1, :])
    p_need = jnp.concatenate(p_rows, axis=0)                 # (H, S)
    wv_need = jnp.concatenate(wv_rows, axis=0)               # (H, D)

    # ---- attention value matmul per batch (B tiny, iterations independent),
    # then a single W_o matmul over the (B, H*D) slab -------------------------
    y_rows = []
    for b in range(B):
        v_b = v_flat[b * S:(b + 1) * S, :]                                    # (S, D)
        y_b = jnp.dot(p_need, v_b, preferred_element_type=jnp.float32) * wv_need  # (H, D)
        # flatten head blocks into lanes (static row slices + lane concat)
        y_rows.append(jnp.concatenate([y_b[c:c + 1, :] for c in range(H)], axis=1))
    y_all = jnp.concatenate(y_rows, axis=0)                                   # (B, H*D)
    x = jnp.dot(y_all, woT, preferred_element_type=jnp.float32)               # (B, D)

    # ---- W_N bias term at row S-1.  torch broadcasting makes W_N @ (e-E_wte)
    # (1,B,S,D) and sum(dim=1) sums over BATCH, broadcast-added to every row. --
    bias_last = v_flat[S - 1:S, :]
    for b in range(1, B):
        bias_last = bias_last + v_flat[b * S + S - 1:b * S + S, :]
    x = x + bias_last * (1.0 / float(S))                                      # (B, D)

    # ---- MLP residual (exact-erf GELU); fc1 pad cols are 0 => gelu(0) = 0 ----
    if USE_FF:
        h1 = _gelu_exact(jnp.dot(x, fc1T_pad, preferred_element_type=jnp.float32))
        x = x + jnp.dot(h1, fc2T, preferred_element_type=jnp.float32)
        # dropout(p=0.0) == identity

    # ---- tied lm_head, one lane-dense (B, 128) store -------------------------
    logits_ref[...] = jnp.dot(x, wteT_pad, preferred_element_type=jnp.float32)


def _fused_forward_call(pack_a, pack_b, idx_col, batch, seq):
    kern = functools.partial(_gdgpt_fused_kernel, batch=batch, seq=seq,
                             n_vocab=VOCAB_SIZE)
    return pl.pallas_call(
        kern,
        out_shape=jax.ShapeDtypeStruct((batch, V_PAD), jnp.float32),
        in_specs=[pl.BlockSpec(memory_space=pltpu.MemorySpace.VMEM)] * 3,
        out_specs=pl.BlockSpec(memory_space=pltpu.MemorySpace.VMEM),
    )(idx_col, pack_a, pack_b)


# ------------------------------ model glue ------------------------------------
def pack_params(params):
    """One-time packing of all forward operands (pre-padded / pre-transposed).

    Only blocks[-1] is packed: torch feeds the SAME (e, p) into every block and
    only the last block's output reaches lm_head, so earlier blocks are dead.
    TODO(synk): if params are updated (training), pack_params must be re-run.
    """
    wte, wpe = params["wte"], params["wpe"]
    lp = params["blocks"][-1]
    D, H, C = D_EMBED, N_HEAD, CONTEXT_SIZE

    wv_eff = lp["wv"] * lp["wlr"][:, None] if USE_W_LR else lp["wv"]

    pack_a = jnp.zeros((A_ROWS, D), jnp.float32)
    pack_a = pack_a.at[A_WTE:A_WTE + VOCAB_SIZE].set(wte)
    pack_a = pack_a.at[A_QP:A_QP + C].set(wpe[1:C + 1])
    pack_a = pack_a.at[A_KP:A_KP + C].set(wpe[:C])
    pack_a = pack_a.at[A_WQ:A_WQ + H].set(lp["wq"])
    pack_a = pack_a.at[A_WK:A_WK + H].set(lp["wk"])
    pack_a = pack_a.at[A_WVE:A_WVE + H].set(wv_eff)
    pack_a = pack_a.at[A_WOT:A_WOT + H * D].set(lp["wo"].T)
    pack_a = pack_a.at[A_FC2T:A_FC2T + D_FF].set(lp["fc2"].T)

    pack_b = jnp.zeros((B_ROWS, V_PAD), jnp.float32)
    pack_b = pack_b.at[B_WTET:B_WTET + D, :VOCAB_SIZE].set(wte.T)
    pack_b = pack_b.at[B_FC1T:B_FC1T + D, :D_FF].set(lp["fc1"].T)
    return {"pack_a": pack_a, "pack_b": pack_b}


def gdgpt_forward(packed, idx):
    """Equivalent of gdGPT.forward(idx, targets=None) -> logits (B, 1, V)."""
    B, S = idx.shape
    assert S <= CONTEXT_SIZE
    # The only per-call host op: a free row-major reshape of the int32 ids.
    idx_col = idx.reshape(B * S, 1).astype(jnp.int32)
    logits_pad = _fused_forward_call(packed["pack_a"], packed["pack_b"],
                                     idx_col, B, S)
    return logits_pad[:, None, :VOCAB_SIZE]                 # (B, 1, V)


# ------------------------------ init ------------------------------------------
def init_params(key):
    def normal(k, shape, std):
        return std * jax.random.normal(k, shape, dtype=jnp.float32)

    n_keys = 2 + 7 * N_LAYER
    keys = jax.random.split(key, n_keys)
    ki = iter(range(n_keys))

    params = {
        # tied wte / lm_head weight (lm_head init wins in torch: std 0.02)
        "wte": normal(keys[next(ki)], (VOCAB_SIZE, D_EMBED), 0.02),
        "wpe": normal(keys[next(ki)], (CONTEXT_SIZE + 1, D_EMBED), 0.2),
        "blocks": [],
    }
    wo_std = 0.02 / math.sqrt(2.0 * N_LAYER)
    for _ in range(N_LAYER):
        lp = {
            "wq":  normal(keys[next(ki)], (N_HEAD, D_EMBED), 0.2),
            "wk":  normal(keys[next(ki)], (N_HEAD, D_EMBED), 0.2),
            "wv":  normal(keys[next(ki)], (N_HEAD, D_EMBED), 0.2),
            "wlr": normal(keys[next(ki)], (N_HEAD,), 0.01),
            "wo":  normal(keys[next(ki)], (D_EMBED, N_HEAD * D_EMBED), wo_std),
            "fc1": normal(keys[next(ki)], (D_FF, D_EMBED), 0.02),
            "fc2": normal(keys[next(ki)], (D_EMBED, D_FF), 0.02),
        }
        params["blocks"].append(lp)
    return params


# ------------------------------ pure-JAX reference ----------------------------
def _reference_forward(params, idx):
    """Direct transcription of gdGPT.forward(idx, targets=None) in plain JAX."""
    wte, wpe = params["wte"], params["wpe"]
    B, S = idx.shape
    V, D = wte.shape
    H = N_HEAD
    e = wte[idx]                                        # (B, S, D)
    p = wpe[:S + 1]                                     # (S+1, D)
    E_wte = jnp.sum(wte, axis=0) / V
    wn = 1.0 / (jnp.arange(S, dtype=jnp.float32) + 1.0)
    mask = jnp.tril(jnp.ones((S, S), dtype=bool))
    x = None
    for lp in params["blocks"]:
        q = p[1:S + 1][None] * lp["wq"][:, None, :]                         # (H,S,D)
        k = p[:S][None] * lp["wk"][:, None, :]                              # (H,S,D)
        v = (e - E_wte)[:, None, :, :] * lp["wv"][None, :, None, :]         # (B,H,S,D)
        att = jnp.einsum("hsd,htd->hst", q, k)
        att = jnp.where(mask[None], att, -jnp.inf)
        att = jax.nn.softmax(att, axis=-1)
        y = jnp.einsum("hst,bhtd->bhsd", att, v)                            # (B,H,S,D)
        y = y * wn[None, None, :, None]                                     # W_N
        y = y * lp["wlr"][None, :, None, None]                              # W_LR
        y = y.reshape(B, S, H * D) @ lp["wo"].T                             # view + W_o
        bterm = (e - E_wte) * wn[None, :, None]
        y = y + jnp.sum(bterm, axis=0, keepdims=True)                       # batch-sum quirk
        if USE_FF:
            h1 = jax.nn.gelu(y @ lp["fc1"].T, approximate=False)
            y = y + h1 @ lp["fc2"].T
        x = y
    return x[:, S - 1:S, :] @ wte.T                                         # (B, 1, V)


# ------------------------------ main ------------------------------------------
if __name__ == "__main__":
    B, S = 2, 8
    key = jax.random.PRNGKey(0)
    k_params, k_idx = jax.random.split(key)

    params = init_params(k_params)
    packed = pack_params(params)            # one-time, outside the per-call path
    idx = jax.random.randint(k_idx, (B, S), 0, VOCAB_SIZE, dtype=jnp.int32)

    logits = jax.jit(gdgpt_forward)(packed, idx)
    jax.block_until_ready(logits)

    assert logits.shape == (B, 1, VOCAB_SIZE), logits.shape
    assert logits.dtype == jnp.float32

    ref = _reference_forward(params, idx)
    np.testing.assert_allclose(np.asarray(logits), np.asarray(ref),
                               rtol=1e-3, atol=1e-5)
    print("KERNEL_OK")
</pallas_src>

<mosaic_0001>
module attributes {stable_mosaic.version = 11 : i64} {
  func.func @_gdgpt_fused_kernel(%arg0: memref<16x1xi32, #tpu.memory_space<vmem>>, %arg1: memref<376x32xf32, #tpu.memory_space<vmem>>, %arg2: memref<64x128xf32, #tpu.memory_space<vmem>>, %arg3: memref<2x128xf32, #tpu.memory_space<vmem>>) attributes {dimension_semantics = [], scalar_prefetch = 0 : i64, scratch_operands = 0 : i64, tpu.core_type = #tpu.core_type<tc>} {
    %c0 = arith.constant 0 : index
    %c0_0 = arith.constant 0 : index
    %0 = vector.load %arg1[%c0, %c0_0] : memref<376x32xf32, #tpu.memory_space<vmem>>, vector<128x32xf32>
    %c128 = arith.constant 128 : index
    %c0_1 = arith.constant 0 : index
    %1 = vector.load %arg1[%c128, %c0_1] : memref<376x32xf32, #tpu.memory_space<vmem>>, vector<8x32xf32>
    %c144 = arith.constant 144 : index
    %c0_2 = arith.constant 0 : index
    %2 = vector.load %arg1[%c144, %c0_2] : memref<376x32xf32, #tpu.memory_space<vmem>>, vector<8x32xf32>
    %c160 = arith.constant 160 : index
    %c0_3 = arith.constant 0 : index
    %3 = vector.load %arg1[%c160, %c0_3] : memref<376x32xf32, #tpu.memory_space<vmem>>, vector<8x32xf32>
    %c168 = arith.constant 168 : index
    %c0_4 = arith.constant 0 : index
    %4 = vector.load %arg1[%c168, %c0_4] : memref<376x32xf32, #tpu.memory_space<vmem>>, vector<8x32xf32>
    %c176 = arith.constant 176 : index
    %c0_5 = arith.constant 0 : index
    %5 = vector.load %arg1[%c176, %c0_5] : memref<376x32xf32, #tpu.memory_space<vmem>>, vector<8x32xf32>
    %c184 = arith.constant 184 : index
    %c0_6 = arith.constant 0 : index
    %6 = vector.load %arg1[%c184, %c0_6] : memref<376x32xf32, #tpu.memory_space<vmem>>, vector<64x32xf32>
    %c248 = arith.constant 248 : index
    %c0_7 = arith.constant 0 : index
    %7 = vector.load %arg1[%c248, %c0_7] : memref<376x32xf32, #tpu.memory_space<vmem>>, vector<128x32xf32>
    %c0_8 = arith.constant 0 : index
    %c0_9 = arith.constant 0 : index
    %8 = vector.load %arg2[%c0_8, %c0_9] : memref<64x128xf32, #tpu.memory_space<vmem>>, vector<32x128xf32>
    %c32 = arith.constant 32 : index
    %c0_10 = arith.constant 0 : index
    %9 = vector.load %arg2[%c32, %c0_10] : memref<64x128xf32, #tpu.memory_space<vmem>>, vector<32x128xf32>
    %cst = arith.constant dense<0.000000e+00> : vector<32xf32>
    %10 = vector.multi_reduction <add>, %0, %cst [0] : vector<128x32xf32> to vector<32xf32>
    %11 = vector.shape_cast %10 : vector<32xf32> to vector<1x32xf32>
    %cst_11 = arith.constant 1.562500e-02 : f32
    %12 = vector.broadcast %cst_11 : f32 to vector<1x32xf32>
    %13 = arith.mulf %11, %12 : vector<1x32xf32>
    %c0_12 = arith.constant 0 : index
    %c0_13 = arith.constant 0 : index
    %14 = vector.load %arg0[%c0_12, %c0_13] : memref<16x1xi32, #tpu.memory_space<vmem>>, vector<16x1xi32>
    %15 = tpu.iota {dimensions = array<i32: 1>} : vector<16x128xi32>
    %16 = vector.broadcast %14 : vector<16x1xi32> to vector<16x128xi32>
    %17 = arith.cmpi eq, %16, %15 : vector<16x128xi32>
    %18 = arith.extui %17 : vector<16x128xi1> to vector<16x128xi32>
    %19 = arith.sitofp %18 : vector<16x128xi32> to vector<16x128xf32>
    %cst_14 = arith.constant dense<0.000000e+00> : vector<16x32xf32>
    %20 = tpu.matmul %19, %0, %cst_14 {dimension_numbers = #tpu.dot_dimension_numbers<[1], [0], [0], [1], [0, 0, 1, 1], [], []>} : vector<16x128xf32>, vector<128x32xf32>, vector<16x32xf32> -> vector<16x32xf32>
    %21 = vector.broadcast %13 : vector<1x32xf32> to vector<16x32xf32>
    %22 = arith.subf %20, %21 : vector<16x32xf32>
    %23 = tpu.iota {dimensions = array<i32: 0>} : vector<8x8xi32>
    %24 = tpu.iota {dimensions = array<i32: 1>} : vector<8x8xi32>
    %25 = arith.cmpi sle, %24, %23 : vector<8x8xi32>
    %26 = vector.extract_strided_slice %3 {offsets = [1, 0], sizes = [1, 32], strides = [1, 1]} : vector<8x32xf32> to vector<1x32xf32>
    %27 = vector.broadcast %26 : vector<1x32xf32> to vector<8x32xf32>
    %28 = arith.mulf %1, %27 : vector<8x32xf32>
    %29 = vector.extract_strided_slice %4 {offsets = [1, 0], sizes = [1, 32], strides = [1, 1]} : vector<8x32xf32> to vector<1x32xf32>
    %30 = vector.broadcast %29 : vector<1x32xf32> to vector<8x32xf32>
    %31 = arith.mulf %2, %30 : vector<8x32xf32>
    %cst_15 = arith.constant dense<0.000000e+00> : vector<8x8xf32>
    %32 = tpu.matmul %28, %31, %cst_15 {dimension_numbers = #tpu.dot_dimension_numbers<[1], [1], [0], [0], [0, 0, 1, 0], [], []>} : vector<8x32xf32>, vector<8x32xf32>, vector<8x8xf32> -> vector<8x8xf32>
    %cst_16 = arith.constant -1.000000e+30 : f32
    %33 = vector.broadcast %cst_16 : f32 to vector<8x8xf32>
    %34 = arith.select %25, %32, %33 : vector<8x8xi1>, vector<8x8xf32>
    %cst_17 = arith.constant dense<0xFF800000> : vector<8xf32>
    %35 = vector.multi_reduction <maximumf>, %34, %cst_17 [1] : vector<8x8xf32> to vector<8xf32>
    %36 = vector.shape_cast %35 : vector<8xf32> to vector<8x1xf32>
    %37 = vector.broadcast %36 : vector<8x1xf32> to vector<8x8xf32>
    %38 = arith.subf %34, %37 : vector<8x8xf32>
    %39 = math.exp %38 : vector<8x8xf32>
    %cst_18 = arith.constant dense<0.000000e+00> : vector<8xf32>
    %40 = vector.multi_reduction <add>, %39, %cst_18 [1] : vector<8x8xf32> to vector<8xf32>
    %41 = vector.shape_cast %40 : vector<8xf32> to vector<8x1xf32>
    %42 = tpu.reciprocal %41 {approx = true} : vector<8x1xf32> -> vector<8x1xf32>
    %43 = vector.broadcast %42 : vector<8x1xf32> to vector<8x8xf32>
    %44 = arith.mulf %39, %43 : vector<8x8xf32>
    %45 = vector.extract_strided_slice %44 {offsets = [6, 0], sizes = [1, 8], strides = [1, 1]} : vector<8x8xf32> to vector<1x8xf32>
    %cst_19 = arith.constant 0.142857149 : f32
    %46 = vector.broadcast %cst_19 : f32 to vector<1x8xf32>
    %47 = arith.mulf %45, %46 : vector<1x8xf32>
    %48 = vector.extract_strided_slice %5 {offsets = [1, 0], sizes = [1, 32], strides = [1, 1]} : vector<8x32xf32> to vector<1x32xf32>
    %49 = vector.extract_strided_slice %44 {offsets = [7, 0], sizes = [1, 8], strides = [1, 1]} : vector<8x8xf32> to vector<1x8xf32>
    %cst_20 = arith.constant 1.250000e-01 : f32
    %50 = vector.broadcast %cst_20 : f32 to vector<1x8xf32>
    %51 = arith.mulf %49, %50 : vector<1x8xf32>
    %52 = vector.extract_strided_slice %5 {offsets = [1, 0], sizes = [1, 32], strides = [1, 1]} : vector<8x32xf32> to vector<1x32xf32>
    %53 = tpu.concatenate %47, %51 in 0 : vector<1x8xf32>, vector<1x8xf32> -> vector<2x8xf32>
    %54 = tpu.concatenate %48, %52 in 0 : vector<1x32xf32>, vector<1x32xf32> -> vector<2x32xf32>
    %55 = vector.extract_strided_slice %22 {offsets = [0, 0], sizes = [8, 32], strides = [1, 1]} : vector<16x32xf32> to vector<8x32xf32>
    %cst_21 = arith.constant dense<0.000000e+00> : vector<2x32xf32>
    %56 = tpu.matmul %53, %55, %cst_21 {dimension_numbers = #tpu.dot_dimension_numbers<[1], [0], [0], [1], [0, 0, 1, 1], [], []>} : vector<2x8xf32>, vector<8x32xf32>, vector<2x32xf32> -> vector<2x32xf32>
    %57 = arith.mulf %56, %54 : vector<2x32xf32>
    %58 = vector.extract_strided_slice %57 {offsets = [0, 0], sizes = [1, 32], strides = [1, 1]} : vector<2x32xf32> to vector<1x32xf32>
    %59 = vector.extract_strided_slice %57 {offsets = [1, 0], sizes = [1, 32], strides = [1, 1]} : vector<2x32xf32> to vector<1x32xf32>
    %60 = tpu.concatenate %58, %59 in 1 : vector<1x32xf32>, vector<1x32xf32> -> vector<1x64xf32>
    %61 = vector.extract_strided_slice %22 {offsets = [8, 0], sizes = [8, 32], strides = [1, 1]} : vector<16x32xf32> to vector<8x32xf32>
    %cst_22 = arith.constant dense<0.000000e+00> : vector<2x32xf32>
    %62 = tpu.matmul %53, %61, %cst_22 {dimension_numbers = #tpu.dot_dimension_numbers<[1], [0], [0], [1], [0, 0, 1, 1], [], []>} : vector<2x8xf32>, vector<8x32xf32>, vector<2x32xf32> -> vector<2x32xf32>
    %63 = arith.mulf %62, %54 : vector<2x32xf32>
    %64 = vector.extract_strided_slice %63 {offsets = [0, 0], sizes = [1, 32], strides = [1, 1]} : vector<2x32xf32> to vector<1x32xf32>
    %65 = vector.extract_strided_slice %63 {offsets = [1, 0], sizes = [1, 32], strides = [1, 1]} : vector<2x32xf32> to vector<1x32xf32>
    %66 = tpu.concatenate %64, %65 in 1 : vector<1x32xf32>, vector<1x32xf32> -> vector<1x64xf32>
    %67 = tpu.concatenate %60, %66 in 0 : vector<1x64xf32>, vector<1x64xf32> -> vector<2x64xf32>
    %cst_23 = arith.constant dense<0.000000e+00> : vector<2x32xf32>
    %68 = tpu.matmul %67, %6, %cst_23 {dimension_numbers = #tpu.dot_dimension_numbers<[1], [0], [0], [1], [0, 0, 1, 1], [], []>} : vector<2x64xf32>, vector<64x32xf32>, vector<2x32xf32> -> vector<2x32xf32>
    %69 = vector.extract_strided_slice %22 {offsets = [7, 0], sizes = [1, 32], strides = [1, 1]} : vector<16x32xf32> to vector<1x32xf32>
    %70 = vector.extract_strided_slice %22 {offsets = [15, 0], sizes = [1, 32], strides = [1, 1]} : vector<16x32xf32> to vector<1x32xf32>
    %71 = arith.addf %69, %70 : vector<1x32xf32>
    %cst_24 = arith.constant 1.250000e-01 : f32
    %72 = vector.broadcast %cst_24 : f32 to vector<1x32xf32>
    %73 = arith.mulf %71, %72 : vector<1x32xf32>
    %74 = vector.broadcast %73 : vector<1x32xf32> to vector<2x32xf32>
    %75 = arith.addf %68, %74 : vector<2x32xf32>
    %cst_25 = arith.constant dense<0.000000e+00> : vector<2x128xf32>
    %76 = tpu.matmul %75, %9, %cst_25 {dimension_numbers = #tpu.dot_dimension_numbers<[1], [0], [0], [1], [0, 0, 1, 1], [], []>} : vector<2x32xf32>, vector<32x128xf32>, vector<2x128xf32> -> vector<2x128xf32>
    %cst_26 = arith.constant 5.000000e-01 : f32
    %77 = vector.broadcast %cst_26 : f32 to vector<2x128xf32>
    %78 = arith.mulf %77, %76 : vector<2x128xf32>
    %cst_27 = arith.constant 0.707106769 : f32
    %79 = vector.broadcast %cst_27 : f32 to vector<2x128xf32>
    %80 = arith.mulf %76, %79 : vector<2x128xf32>
    %cst_28 = arith.constant 0.000000e+00 : f32
    %81 = vector.broadcast %cst_28 : f32 to vector<2x128xf32>
    %82 = arith.cmpf oge, %80, %81 : vector<2x128xf32>
    %cst_29 = arith.constant 1.000000e+00 : f32
    %cst_30 = arith.constant -1.000000e+00 : f32
    %83 = vector.broadcast %cst_29 : f32 to vector<2x128xf32>
    %84 = vector.broadcast %cst_30 : f32 to vector<2x128xf32>
    %85 = arith.select %82, %83, %84 : vector<2x128xi1>, vector<2x128xf32>
    %86 = math.absf %80 : vector<2x128xf32>
    %cst_31 = arith.constant 0.327591091 : f32
    %87 = vector.broadcast %cst_31 : f32 to vector<2x128xf32>
    %88 = arith.mulf %87, %86 : vector<2x128xf32>
    %cst_32 = arith.constant 1.000000e+00 : f32
    %89 = vector.broadcast %cst_32 : f32 to vector<2x128xf32>
    %90 = arith.addf %89, %88 : vector<2x128xf32>
    %cst_33 = arith.constant 1.000000e+00 : f32
    %91 = vector.broadcast %cst_33 : f32 to vector<2x128xf32>
    %92 = arith.divf %91, %90 : vector<2x128xf32>
    %cst_34 = arith.constant 1.06140542 : f32
    %93 = vector.broadcast %cst_34 : f32 to vector<2x128xf32>
    %94 = arith.mulf %93, %92 : vector<2x128xf32>
    %cst_35 = arith.constant -1.45315206 : f32
    %95 = vector.broadcast %cst_35 : f32 to vector<2x128xf32>
    %96 = arith.addf %94, %95 : vector<2x128xf32>
    %97 = arith.mulf %96, %92 : vector<2x128xf32>
    %cst_36 = arith.constant 1.42141378 : f32
    %98 = vector.broadcast %cst_36 : f32 to vector<2x128xf32>
    %99 = arith.addf %97, %98 : vector<2x128xf32>
    %100 = arith.mulf %99, %92 : vector<2x128xf32>
    %cst_37 = arith.constant -0.284496725 : f32
    %101 = vector.broadcast %cst_37 : f32 to vector<2x128xf32>
    %102 = arith.addf %100, %101 : vector<2x128xf32>
    %103 = arith.mulf %102, %92 : vector<2x128xf32>
    %cst_38 = arith.constant 0.254829586 : f32
    %104 = vector.broadcast %cst_38 : f32 to vector<2x128xf32>
    %105 = arith.addf %103, %104 : vector<2x128xf32>
    %106 = arith.mulf %105, %92 : vector<2x128xf32>
    %cst_39 = arith.constant 0.000000e+00 : f32
    %107 = vector.broadcast %cst_39 : f32 to vector<2x128xf32>
    %108 = arith.subf %107, %86 : vector<2x128xf32>
    %109 = arith.mulf %108, %86 : vector<2x128xf32>
    %110 = math.exp %109 : vector<2x128xf32>
    %111 = arith.mulf %106, %110 : vector<2x128xf32>
    %cst_40 = arith.constant 1.000000e+00 : f32
    %112 = vector.broadcast %cst_40 : f32 to vector<2x128xf32>
    %113 = arith.subf %112, %111 : vector<2x128xf32>
    %114 = arith.mulf %85, %113 : vector<2x128xf32>
    %cst_41 = arith.constant 1.000000e+00 : f32
    %115 = vector.broadcast %cst_41 : f32 to vector<2x128xf32>
    %116 = arith.addf %115, %114 : vector<2x128xf32>
    %117 = arith.mulf %78, %116 : vector<2x128xf32>
    %cst_42 = arith.constant dense<0.000000e+00> : vector<2x32xf32>
    %118 = tpu.matmul %117, %7, %cst_42 {dimension_numbers = #tpu.dot_dimension_numbers<[1], [0], [0], [1], [0, 0, 1, 1], [], []>} : vector<2x128xf32>, vector<128x32xf32>, vector<2x32xf32> -> vector<2x32xf32>
    %119 = arith.addf %75, %118 : vector<2x32xf32>
    %cst_43 = arith.constant dense<0.000000e+00> : vector<2x128xf32>
    %120 = tpu.matmul %119, %8, %cst_43 {dimension_numbers = #tpu.dot_dimension_numbers<[1], [0], [0], [1], [0, 0, 1, 1], [], []>} : vector<2x32xf32>, vector<32x128xf32>, vector<2x128xf32> -> vector<2x128xf32>
    %c0_44 = arith.constant 0 : index
    %c0_45 = arith.constant 0 : index
    %121 = vector.load %arg3[%c0_44, %c0_45] : memref<2x128xf32, #tpu.memory_space<vmem>>, vector<2x128xf32>
    tpu.vector_store %arg3[%c0_44, %c0_45], %120 {strides = array<i32>} : memref<2x128xf32, #tpu.memory_space<vmem>>, vector<2x128xf32>,
    return
  }
}

</mosaic_0001>

<bundles_post_ra>
// kernel: gdgpt_forward.1
= control target key start
LH: loop header
LB: loop body
LE: loop exit
PB: predicated region body
PF: predicated region fallthrough
CT: control target
= control target key end

     0   :  { %v471_v5 = vmov 0   ;;  %s725_s0 = inlined_call_operand.vmem [shape: s32[16,1], index: 0, kind: input, shape index: {}]   ;;  %s726_s1 = inlined_call_operand.vmem [shape: f32[376,32], index: 1, kind: input, shape index: {}]   ;;  %s727_s2 = inlined_call_operand.vmem [shape: f32[64,128], index: 2, kind: input, shape index: {}]   ;;  %s728_s3 = inlined_call_operand.hbm [shape: f32[2,128], index: 3, kind: output, shape index: {}]  }
   0x1   :  { %v32_v0 = vld [vmem:[%s726_s1 + $0x90] sm:$0xff]  ;;  %v34_v1 = vld [vmem:[%s726_s1 + $0xa8] sm:$0xff]  ;;  %v31_v2 = vld [vmem:[%s726_s1 + $0x80] sm:$0xff]  ;;  %436 = vset.pattern.permute.xlu0 %v471_v5 }
   0x2   :  { %v153_v3 = vperm.slane %v34_v1, 1  ;;  %v33_v4 = vld [vmem:[%s726_s1 + $0xa0] sm:$0xff] }
   0x3   :  { %v107_v6 = vld [vmem:[%s725_s0] sm:$0xff] }
   0x4   :  { %8 = vsyncpa [#allocation3], 0  ;;  %vm68_vm0 = vcmask 261120   ;;  %v151_v7 = vperm.slane %v33_v4, 1  ;;  %112 = vperm.xlu0 %436, %v107_v6   ;;  %v154_v8 = vmul.f32 %v153_v3, %v32_v0  ;;  %v108_v10 = vld [vmem:[%s725_s0 + $0x8] sm:$0xff]  ;;  %v519_v11 = vld [vmem:[%s726_s1 + $0x78] sm:$0xff]  ;;  %v109_v42 = vlaneseq }
   0x5   :  { %v524_v12 = vld [vmem:[%s726_s1 + $0x70] sm:$0xff]  ;;  %123 = vmatpush.msra.mxu0 %v519_v11  ;;  %v530_v13 = vld [vmem:[%s726_s1 + $0x68] sm:$0xff]  ;;  %v536_v14 = vld [vmem:[%s726_s1 + $0x60] sm:$0xff]  ;;  %vm182_vm2 = vcmask 64512   ;;  %v472_v53 = vmov 1.0   ;;  %v98_v0 = vsel %vm68_vm0, %v519_v11, 0.0 }
   0x6   :  { %v152_v9 = vmul.f32 %v151_v7, %v31_v2  ;;  %424 = vmatpush.xpose.msk.msra.mxu1 %vm68_vm0, %v154_v8  ;;  %v17_v15 = vld [vmem:[%s726_s1 + $0x10] sm:$0xff]  ;;  %v16_v16 = vld [vmem:[%s726_s1 + $0x8] sm:$0xff]  ;;  %v15_v17 = vld [vmem:[%s726_s1] sm:$0xff]  ;;  %v110_v46 = vand.u32 127, %v109_v42  ;;  %v149_v47 = vshrl.u32 %v109_v42, 7  ;;  %v92_v58 = vsel %vm68_vm0, %v536_v14, 0.0 }
   0x7   :  { %124 = vmatpush.msra.mxu0 %v524_v12  ;;  %v26_v18 = vld [vmem:[%s726_s1 + $0x58] sm:$0xff]  ;;  %v72_v19 = vsel %vm68_vm0, %v17_v15, 0.0  ;;  %v70_v20 = vsel %vm68_vm0, %v16_v16, 0.0  ;;  %v69_v21 = vsel %vm68_vm0, %v15_v17, 0.0  ;;  %v25_v24 = vld [vmem:[%s726_s1 + $0x50] sm:$0xff]  ;;  %v19_v26 = vld [vmem:[%s726_s1 + $0x20] sm:$0xff] }
   0x8   :  { %v18_v22 = vld [vmem:[%s726_s1 + $0x18] sm:$0xff]  ;;  %v71_v23 = vadd.f32 %v70_v20, %v69_v21  ;;  %v24_v28 = vld [vmem:[%s726_s1 + $0x48] sm:$0xff]  ;;  %v76_v29 = vsel %vm68_vm0, %v19_v26, 0.0  ;;  %v23_v32 = vld [vmem:[%s726_s1 + $0x40] sm:$0xff]  ;;  %vm150_vm1 = vcmp.le.s32.totalorder %v110_v46, %v149_v47  ;;  %v88_v55 = vsel %vm68_vm0, %v25_v24, 0.0  ;;  %s473_s6 = smov 32  }
   0x9   :  { %425 = vmatmul.msk.f32.vlgmr.msra.gmra.mxu1 %vm68_vm0, %v152_v9  ;;  %125 = vmatpush.msra.mxu0 %v530_v13  ;;  %v74_v25 = vsel %vm68_vm0, %v18_v22, 0.0  ;;  %v20_v30 = vld [vmem:[%s726_s1 + $0x28] sm:$0xff]  ;;  %v21_v34 = vld [vmem:[%s726_s1 + $0x30] sm:$0xff]  ;;  %v22_v36 = vld [vmem:[%s726_s1 + $0x38] sm:$0xff]  ;;  %v84_v41 = vsel %vm68_vm0, %v23_v32, 0.0  ;;  %v86_v44 = vsel %vm68_vm0, %v24_v28, 0.0 }
   0xa   :  { %v73_v27 = vadd.f32 %v72_v19, %v71_v23  ;;  %v78_v33 = vsel %vm68_vm0, %v20_v30, 0.0  ;;  %v80_v37 = vsel %vm68_vm0, %v21_v34, 0.0  ;;  %v82_v39 = vsel %vm68_vm0, %v22_v36, 0.0  ;;  %v37_v42 = vld [vmem:[%s726_s1 + $0xc0] sm:$0xff]  ;;  %s475_s10 = smov [#allocation2]   ;;  %s411_s14 = sshll.u32 %s728_s3, 4  ;;  %s412_s14 = int_to_ptr.hbm [resolvable:$true] %s411_s14 }
   0xb   :  { %126 = vmatpush.msra.mxu0 %v536_v14  ;;  %v90_v56 = vsel %vm68_vm0, %v26_v18, 0.0  ;;  %v94_v60 = vsel %vm68_vm0, %v530_v13, 0.0  ;;  %v96_v62 = vsel %vm68_vm0, %v524_v12, 0.0  ;;  %vm202_vm5 = vcmask 1040384   ;;  %s409_s11 = sshll.u32 %s475_s10, 4  ;;  %s410_s11 = int_to_ptr.vmem [resolvable:$true] %s409_s11 }
   0xc   :  { %115 = vperm.xlu0 %436, %v108_v10   ;;  %v75_v31 = vadd.f32 %v74_v25, %v73_v27  ;;  %v43_v27 = vld [vmem:[%s726_s1 + $0xf0] sm:$0xff]  ;;  %vm272_vm6 = vcmask 523264  }
   0xd   :  { %127 = vmatpush.msra.mxu0 %v26_v18 }
   0xe   :  { %v77_v35 = vadd.f32 %v76_v29, %v75_v31  ;;  %v35_v29 = vld [vmem:[%s726_s1 + $0xb0] sm:$0xff] }
   0xf   :  { %128 = vmatpush.msra.mxu0 %v25_v24 }
  0x10   :  { %v79_v38 = vadd.f32 %v78_v33, %v77_v35 }
  0x11   :  { %129 = vmatpush.msra.mxu0 %v24_v28  ;;  %v42_v28 = vld [vmem:[%s726_s1 + $0xe8] sm:$0xff] }
  0x12   :  { %v81_v40 = vadd.f32 %v80_v37, %v79_v38  ;;  %v41_v38 = vld [vmem:[%s726_s1 + $0xe0] sm:$0xff] }
  0x13   :  { %130 = vmatpush.msra.mxu0 %v23_v32 }
  0x14   :  { %v83_v43 = vadd.f32 %v82_v39, %v81_v40  ;;  %v40_v39 = vld [vmem:[%s726_s1 + $0xd8] sm:$0xff]  ;;  %v39_v40 = vld [vmem:[%s726_s1 + $0xd0] sm:$0xff] }
  0x15   :  { %131 = vmatpush.msra.mxu0 %v22_v36 }
  0x16   :  { %v85_v45 = vadd.f32 %v84_v41, %v83_v43  ;;  %v38_v41 = vld [vmem:[%s726_s1 + $0xc8] sm:$0xff]  ;;  %v36_v43 = vld [vmem:[%s726_s1 + $0xb8] sm:$0xff] }
  0x17   :  { %132 = vmatpush.msra.mxu0 %v21_v34 }
  0x18   :  { %v87_v48 = vadd.f32 %v86_v44, %v85_v45  ;;  %v67_v44 = vld [vmem:[%s727_s2 + $0x38] sm:$0xff]  ;;  %v66_v45 = vld [vmem:[%s727_s2 + $0x30] sm:$0xff] }
  0x19   :  { %133 = vmatpush.msra.mxu0 %v20_v30  ;;  %v205_v30 = vrot.slane %v35_v29, 1 }
  0x1a   :  { %v89_v57 = vadd.f32 %v88_v55, %v87_v48 }
  0x1b   :  { %134 = vmatpush.msra.mxu0 %v19_v26  ;;  %v207_v31 = vsel %vm202_vm5, %v205_v30, %v35_v29 }
  0x1c   :  { %v91_v59 = vadd.f32 %v90_v56, %v89_v57 }
  0x1d   :  { %135 = vmatpush.msra.mxu0 %v18_v22 }
  0x1e   :  { %v93_v61 = vadd.f32 %v92_v58, %v91_v59  ;;  %v59_v59 = vld [vmem:[%s726_s1 + $0x170] sm:$0xff] }
  0x1f   :  { %136 = vmatpush.msra.mxu0 %v17_v15  ;;  %359 = vmatpush.msrb.mxu1 %v59_v59 }
  0x20   :  { %v95_v63 = vadd.f32 %v94_v60, %v93_v61  ;;  %v58_v60 = vld [vmem:[%s726_s1 + $0x168] sm:$0xff]  ;;  %v57_v61 = vld [vmem:[%s726_s1 + $0x160] sm:$0xff] }
  0x21   :  { %137 = vmatpush.msra.mxu0 %v16_v16  ;;  %360 = vmatpush.msrb.mxu1 %v58_v60 }
  0x22   :  { %v97_v1 = vadd.f32 %v96_v62, %v95_v63  ;;  %v56_v62 = vld [vmem:[%s726_s1 + $0x158] sm:$0xff]  ;;  %v55_v63 = vld [vmem:[%s726_s1 + $0x150] sm:$0xff] }
  0x23   :  { %138 = vmatpush.msra.mxu0 %v15_v17  ;;  %361 = vmatpush.msrb.mxu1 %v57_v61 }
  0x24   :  { %v99_v2 = vadd.f32 %v98_v0, %v97_v1 }
  0x25   :  { %362 = vmatpush.msrb.mxu1 %v56_v62 }
  0x26   :  { %v100_v3 = vrot.slane %v99_v2, 4 }
  0x27   :  { %363 = vmatpush.msrb.mxu1 %v55_v63 }
  0x28   :  { %v101_v4 = vadd.f32 %v100_v3, %v99_v2  ;;  %v54_v2 = vld [vmem:[%s726_s1 + $0x148] sm:$0xff] }
  0x29   :  { %364 = vmatpush.msrb.mxu1 %v54_v2 }
  0x2a   :  { %v102_v5 = vrot.slane %v101_v4, 2 }
  0x2c   :  { %v103_v6 = vadd.f32 %v102_v5, %v101_v4  ;;  %v53_v4 = vld [vmem:[%s726_s1 + $0x140] sm:$0xff] }
  0x2d   :  { %365 = vmatpush.msrb.mxu1 %v53_v4 }
  0x2e   :  { %v104_v9 = vrot.slane %v103_v6, 1 }
  0x30   :  { %v105_v14 = vadd.f32 %v104_v9, %v103_v6  ;;  %v52_v6 = vld [vmem:[%s726_s1 + $0x138] sm:$0xff]  ;;  %v50_v9 = vld [vmem:[%s726_s1 + $0x128] sm:$0xff] }
  0x31   :  { %366 = vmatpush.msrb.mxu1 %v52_v6 }
  0x32   :  { %v106_v13 = vmul.f32 0.015625, %v105_v14  ;;  %v48_v14 = vld [vmem:[%s726_s1 + $0x118] sm:$0xff] }
  0x76   :  { %v113_v49 = vpop.permute.xlu0 %112 }
  0x77   :  { %vm117_vm3 = vcmp.eq.s32.totalorder %v113_v49, %v110_v46 }
  0x78   :  { %422 = vmatmul.msk.f32.vlgmr.msra.gmra.mxu0 %vm117_vm3, %v472_v53 }
  0x7e   :  { %v116_v54 = vpop.permute.xlu0 %115 }
  0x7f   :  { %vm118_vm4 = vcmp.eq.s32.totalorder %v116_v54, %v110_v46  ;;  %v65_v46 = vld [vmem:[%s727_s2 + $0x28] sm:$0xff] }
  0x80   :  { %423 = vmatmul.msk.f32.gmra.mxu0 %vm118_vm4, %v472_v53  ;;  %v64_v53 = vld [vmem:[%s727_s2 + $0x20] sm:$0xff] }
  0x86   :  { %v178_v50 = vpop.f32.mrf.mxu1 }
  0x87   :  { %v181_v51 = vsel %vm150_vm1, %v178_v50, -1e+30 }
  0x88   :  { %v183_v52 = vsel %vm182_vm2, %v181_v51, -inf }
  0x89   :  { %184 = vmax.xlane.f32.xlu1 %v183_v52 }
  0xf5   :  { %v140_v15 = vpop.f32.mrf.mxu0 }
  0xf6   :  { %v597_v12 = vsub.f32 %v140_v15, %v106_v13  ;;  %v47_v15 = vld [vmem:[%s726_s1 + $0x110] sm:$0xff] }
  0xf8   :  { %226 = vmatpush.msra.mxu2 %v597_v12 }
  0xfa   :  { %284 = vmatpush.msrb.mxu2 %v43_v27  ;;  %v61_v27 = vld [vmem:[%s727_s2 + $0x8] sm:$0xff] }
  0xfc   :  { %v185_v7 = vpop.xlane.xlu1 %184  ;;  %285 = vmatpush.msrb.mxu2 %v42_v28 }
  0xfd   :  { %v186_v8 = vsub.f32 %v181_v51, %v185_v7  ;;  %v143_v11 = vpop.f32.mrf.mxu0 }
  0xfe   :  { %v147_v18 = vsub.f32 %v143_v11, %v106_v13  ;;  %286 = vmatpush.msrb.mxu2 %v41_v38 }
  0xff   :  { %v187_v10 = vmul.f32 1.442695, %v186_v8  ;;  %v51_v8 = vld [vmem:[%s726_s1 + $0x130] sm:$0xff] }
 0x100   :  { %253 = vmatpush.msra.mxu3 %v147_v18  ;;  %287 = vmatpush.msrb.mxu2 %v40_v39  ;;  %v269_v54 = vadd.f32 %v147_v18, %v597_v12  ;;  %v46_v12 = vld [vmem:[%s726_s1 + $0x108] sm:$0xff]  ;;  %v45_v18 = vld [vmem:[%s726_s1 + $0x100] sm:$0xff] }
 0x101   :  { %437 = vpow2.f32 %v187_v10  ;;  %367 = vmatpush.msrb.mxu1 %v51_v8  ;;  %v49_v10 = vld [vmem:[%s726_s1 + $0x120] sm:$0xff] }
 0x102   :  { %288 = vmatpush.msrb.mxu2 %v39_v40  ;;  %311 = vmatpush.msrb.mxu3 %v67_v44  ;;  %v270_v55 = vmul.f32 0.125, %v269_v54  ;;  %v474_v44 = vmov -1.0  }
 0x103   :  { %368 = vmatpush.msrb.mxu1 %v50_v9 }
 0x104   :  { %289 = vmatpush.msrb.mxu2 %v38_v41  ;;  %312 = vmatpush.msrb.mxu3 %v66_v45  ;;  %v271_v56 = vperm.slane %v270_v55, 7 }
 0x105   :  { %369 = vmatpush.msrb.mxu1 %v49_v10 }
 0x106   :  { %290 = vmatpush.msrb.mxu2 %v37_v42  ;;  %313 = vmatpush.msrb.mxu3 %v65_v46 }
 0x107   :  { %v438_v16 = vpop.eup %437  ;;  %370 = vmatpush.msrb.mxu1 %v48_v14 }
 0x108   :  { %v189_v17 = vsel %vm182_vm2, %v438_v16, 0.0  ;;  %291 = vmatpush.msrb.mxu2 %v36_v43  ;;  %314 = vmatpush.msrb.mxu3 %v64_v53 }
 0x109   :  { %190 = vadd.xlane.f32.xlu1 %v189_v17  ;;  %371 = vmatpush.msrb.mxu1 %v47_v15 }
 0x10b   :  { %372 = vmatpush.msrb.mxu1 %v46_v12 }
 0x10d   :  { %373 = vmatpush.msrb.mxu1 %v45_v18 }
 0x17c   :  { %v191_v19 = vpop.xlane.xlu1 %190 }
 0x17d   :  { %439 = vrcp.f32 %v191_v19 }
 0x183   :  { %v440_v20 = vpop.eup %439 }
 0x184   :  { %v193_v21 = vmul.f32 %v440_v20, %v438_v16 }
 0x186   :  { %v194_v22 = vmul.f32 0.14285715, %v193_v21  ;;  %v195_v23 = vmul.f32 0.125, %v193_v21  ;;  %v44_v21 = vld [vmem:[%s726_s1 + $0xf8] sm:$0xff] }
 0x187   :  { %374 = vmatpush.msrb.mxu1 %v44_v21 }
 0x188   :  { %v197_v24 = vrot.slane %v194_v22, 6  ;;  %v200_v25 = vrot.slane %v195_v23, 6  ;;  %v63_v23 = vld [vmem:[%s727_s2 + $0x18] sm:$0xff] }
 0x18a   :  { %v203_v26 = vsel %vm202_vm5, %v197_v24, %v200_v25  ;;  %v62_v24 = vld [vmem:[%s727_s2 + $0x10] sm:$0xff] }
 0x18b   :  { %426 = vmatmul.msk.f32.vlgmr.msra.gmra.mxu2 %vm182_vm2, %v203_v26  ;;  %427 = vmatmul.msk.f32.vlgmr.msra.gmra.mxu3 %vm182_vm2, %v203_v26 }
 0x18c   :  { %395 = vmatpush.msra.mxu3 %v63_v23 }
 0x18e   :  { %396 = vmatpush.msra.mxu3 %v62_v24 }
 0x190   :  { %397 = vmatpush.msra.mxu3 %v61_v27 }
 0x20e   :  { %v255_v32 = vpop.f32.mrf.mxu3  ;;  %v228_v35 = vpop.f32.mrf.mxu2 }
 0x20f   :  { %v258_v33 = vmul.f32 %v255_v32, %v207_v31  ;;  %v231_v36 = vmul.f32 %v228_v35, %v207_v31 }
 0x211   :  { %v260_v34 = vrot.slane %v258_v33, 1  ;;  %v233_v37 = vrot.slane %v231_v36, 1 }
 0x213   :  { %261 = vrot.lane.b32.xlu2 %v260_v34, %s473_s6 }
 0x21b   :  { %234 = vrot.lane.b32.xlu2 %v233_v37, %s473_s6 }
 0x26d   :  { %v262_v47 = vpop.permute.xlu2 %261 }
 0x26e   :  { %v264_v48 = vsel %vm68_vm0, %v258_v33, %v262_v47 }
 0x26f   :  { %v266_v49 = vrot.slane %v264_v48, 7 }
 0x275   :  { %v235_v50 = vpop.permute.xlu2 %234 }
 0x276   :  { %v237_v51 = vsel %vm68_vm0, %v231_v36, %v235_v50  ;;  %v60_v50 = vld [vmem:[%s727_s2] sm:$0xff] }
 0x277   :  { %v268_v52 = vsel %vm202_vm5, %v237_v51, %v266_v49  ;;  %398 = vmatpush.msra.mxu3 %v60_v50 }
 0x278   :  { %428 = vmatmul.msk.f32.vlgmr.msrb.gmra.mxu2 %vm272_vm6, %v268_v52 }
 0x2fb   :  { %v293_v57 = vpop.f32.mrf.mxu2 }
 0x2fc   :  { %v648_v58 = vadd.f32 %v293_v57, %v271_v56 }
 0x2fe   :  { %429 = vmatmul.msk.f32.vlgmr.msrb.gmra.mxu3 %vm68_vm0, %v648_v58 }
 0x381   :  { %v667_v0 = vpop.f32.mrf.mxu3 }
 0x382   :  { %v670_v1 = vmul.f32 0.70710677, %v667_v0  ;;  %v319_v47 = vmul.f32 0.5, %v667_v0 }
 0x384   :  { %v323_v3 = vand.u32 2147483647, %v670_v1  ;;  %vm321_vm11 = vcmp.ge.f32.partialorder %v670_v1, 0.0 }
 0x385   :  { %v322_v45 = vsel %vm321_vm11, 1.0, %v474_v44 }
 0x386   :  { %v324_v5 = vmul.f32 0.3275911, %v323_v3  ;;  %v350_v29 = vsub.f32 0.0, %v323_v3 }
 0x388   :  { %v325_v7 = vadd.f32 1.0, %v324_v5  ;;  %v351_v32 = vmul.f32 %v350_v29, %v323_v3 }
 0x38a   :  { %441 = vrcp.f32 %v325_v7  ;;  %v337_v11 = vand.u32 2147483648, %v325_v7  ;;  %v335_v20 = vand.u32 2147483647, %v325_v7  ;;  %vm331_vm8 = vweird.f32 %v325_v7 }
 0x38b   :  { %v352_v35 = vmul.f32 1.442695, %v351_v32 }
 0x38c   :  { %v338_v25 = vor.u32 1.1754944e-38, %v337_v11  ;;  %vm336_vm10 = vcmp.eq.f32.partialorder %v335_v20, 8.507059e+37 }
 0x38d   :  { %443 = vpow2.f32 %v352_v35 }
 0x390   :  { %v442_v13 = vpop.eup %441 }
 0x391   :  { %v327_v16 = vmul.f32 %v442_v13, %v325_v7  ;;  %vm332_vm7 = vweird.f32 %v442_v13 }
 0x392   :  { %vm333_vm9 = vmor %vm331_vm8, %vm332_vm7 }
 0x393   :  { %v328_v17 = vsub.f32 1.0, %v327_v16  ;;  %v444_v41 = vpop.eup %443 }
 0x395   :  { %v329_v19 = vmul.f32 %v442_v13, %v328_v17 }
 0x397   :  { %v330_v22 = vadd.f32 %v442_v13, %v329_v19 }
 0x399   :  { %v334_v26 = vsel %vm333_vm9, %v442_v13, %v330_v22 }
 0x39a   :  { %v339_v28 = vsel %vm336_vm10, %v338_v25, %v334_v26 }
 0x39b   :  { %v341_v30 = vmul.f32 1.0614054, %v339_v28 }
 0x39d   :  { %v342_v31 = vadd.f32 -1.4531521, %v341_v30 }
 0x39f   :  { %v343_v33 = vmul.f32 %v342_v31, %v339_v28 }
 0x3a1   :  { %v344_v34 = vadd.f32 1.4214138, %v343_v33 }
 0x3a3   :  { %v345_v36 = vmul.f32 %v344_v34, %v339_v28 }
 0x3a5   :  { %v346_v37 = vadd.f32 -0.28449672, %v345_v36 }
 0x3a7   :  { %v347_v38 = vmul.f32 %v346_v37, %v339_v28 }
 0x3a9   :  { %v348_v39 = vadd.f32 0.2548296, %v347_v38 }
 0x3ab   :  { %v349_v40 = vmul.f32 %v348_v39, %v339_v28 }
 0x3ad   :  { %v354_v42 = vmul.f32 %v444_v41, %v349_v40 }
 0x3af   :  { %v355_v43 = vsub.f32 1.0, %v354_v42 }
 0x3b1   :  { %v356_v46 = vmul.f32 %v355_v43, %v322_v45 }
 0x3b3   :  { %v357_v48 = vadd.f32 1.0, %v356_v46 }
 0x3b5   :  { %v358_v49 = vmul.f32 %v357_v48, %v319_v47 }
 0x3b7   :  { %375 = vmatmul.f32.vlgmr.msrb.gmra.mxu1 %v358_v49 }
 0x434   :  { %v376_v51 = vpop.f32.mrf.mxu1 }
 0x435   :  { %v379_v52 = vadd.f32 %v376_v51, %v648_v58 }
 0x437   :  { %430 = vmatmul.msk.f32.vlgmr.msra.gmra.mxu3 %vm68_vm0, %v379_v52 }
 0x4ba   :  { %v400_v53 = vpop.f32.mrf.mxu3 }
 0x4bb   :  { %403 = vst [vmem:[#allocation2] sm:$0x3] %v400_v53 }
 0x4bc   :  { %414 = dma.vmem_to_hbm [thread:$0]  %s410_s11, 32, %s412_s14, [#allocation3]  }
 0x4bd   :  { %469 = dma.done.wait [#allocation3], 32  }
 0x4be   :  { %470 = vsyncadd [#allocation3], 4294967264 }
 0x4bf   :  { %419 = vsyncpa [#allocation3], 1 }

</bundles_post_ra>
